<compile_context>
chip_gen: v6e
topology: v6e:2x2x1
jax: 0.10.0
libtpu: 0.0.40
codegen_flags: <defaults>
</compile_context>

<pallas_src>
import math

import jax
import jax.numpy as jnp
from jax.experimental import pallas as pl
from jax.experimental.pallas import tpu as pltpu

QUANT_MIN = -128.0                          # -(1 << (8 - 1)), activation_weight_flag = 1
QUANT_MAX = 127.0                           #  (1 << (8 - 1)) - 1
QUANT_RANGE = (QUANT_MAX - QUANT_MIN) / 2.0  # 127.5 (symmetric quantizer)

LANE_TILE = 1024                  # lane (last) block dim; multiple of 128
MAX_BLOCK_ROWS = 512              # sublane rows per block (512*1024*4 B = 2 MiB f32)
VMEM_LIMIT_BYTES = 32 * 1024 * 1024   # safe on v5e/v6e/v7x; >> our ~12 MiB usage


def _cdiv(a, b):
    return -(-a // b)


# ---------------------------------------------------------------------------
# Phase 0: tiled global abs-max reduction.
# ---------------------------------------------------------------------------
def _absmax_kernel(res_ref, sc_ref, amax_ref):
    i = pl.program_id(0)
    r = res_ref[...].astype(jnp.float32)
    s = sc_ref[...].astype(jnp.float32)
    # abs-max == max(|min|, |max|); one reduction per tensor instead of two.
    tile_max = jnp.maximum(jnp.max(jnp.abs(r)), jnp.max(jnp.abs(s)))

    @pl.when(i == 0)
    def _():
        amax_ref[0, 0] = tile_max

    @pl.when(i > 0)
    def _():
        amax_ref[0, 0] = jnp.maximum(amax_ref[0, 0], tile_max)


# ---------------------------------------------------------------------------
# Phase 1: tiled fake-quant + add, scale via scalar prefetch (SMEM).
# ---------------------------------------------------------------------------
def _fq_add_kernel(scale_ref, res_ref, sc_ref, out_ref):
    scale = scale_ref[0]
    r = res_ref[...].astype(jnp.float32)
    s = sc_ref[...].astype(jnp.float32)

    def fake_quant(x):
        # Divide (not multiply-by-reciprocal) for bit-exact parity with the ref.
        y = x / scale
        # Round half away from zero.  trunc(y + copysign(0.5, y)) is bit-identical
        # to the PyTorch formula sign(y)*floor(|y|+0.5) but cheaper on the VPU.
        q = jnp.trunc(y + jnp.copysign(jnp.float32(0.5), y))
        q = jnp.clip(q, jnp.float32(QUANT_MIN), jnp.float32(QUANT_MAX))
        return q * scale

    out_ref[...] = (fake_quant(r) + fake_quant(s)).astype(out_ref.dtype)


# ---------------------------------------------------------------------------
# Wrapper.
# ---------------------------------------------------------------------------
def quant_add(res, shortcut):
    """QuantAdd forward. res/shortcut: equal-shape float tensors (e.g. NCHW)."""
    res = jnp.asarray(res)
    shortcut = jnp.asarray(shortcut)
    assert res.shape == shortcut.shape
    assert res.dtype == shortcut.dtype

    orig_shape = res.shape
    orig_dtype = res.dtype
    total = int(math.prod(orig_shape))

    # Lane-dense layout: (rows, 1024), tiled in <=512-row blocks.
    cols = LANE_TILE
    rows = _cdiv(total, cols)
    if rows <= MAX_BLOCK_ROWS:
        block_rows = rows                     # full-extent block (always legal)
        rows_padded = rows
    else:
        block_rows = MAX_BLOCK_ROWS           # divisible by 8
        rows_padded = _cdiv(rows, MAX_BLOCK_ROWS) * MAX_BLOCK_ROWS
    padded_total = rows_padded * cols
    n_tiles = rows_padded // block_rows

    flat_r = res.reshape(-1)
    flat_s = shortcut.reshape(-1)
    pad = padded_total - total
    if pad:
        # Zero padding is neutral for abs-max; padded outputs are sliced off.
        flat_r = jnp.pad(flat_r, (0, pad))
        flat_s = jnp.pad(flat_s, (0, pad))
    res2d = flat_r.reshape(rows_padded, cols)
    sc2d = flat_s.reshape(rows_padded, cols)

    # ---- Phase 0: global abs-max over both tensors -> (1,1) f32 in SMEM ----
    # (Optional tuning knob: pipeline_mode=pl.Buffered(3) on these in_specs.)
    amax = pl.pallas_call(
        _absmax_kernel,
        out_shape=jax.ShapeDtypeStruct((1, 1), jnp.float32),
        grid_spec=pl.GridSpec(
            grid=(n_tiles,),
            in_specs=[
                pl.BlockSpec((block_rows, cols), lambda i: (i, 0)),
                pl.BlockSpec((block_rows, cols), lambda i: (i, 0)),
            ],
            out_specs=pl.BlockSpec(memory_space=pltpu.MemorySpace.SMEM),
        ),
        compiler_params=pltpu.CompilerParams(
            dimension_semantics=("arbitrary",),
            vmem_limit_bytes=VMEM_LIMIT_BYTES,
        ),
    )(res2d, sc2d)

    # ---- Scale (SymmetricQuantizer.update_qparams); trivial scalar math ----
    eps = jnp.float32(jnp.finfo(jnp.float32).eps)
    scale = jnp.maximum(amax[0, 0] / jnp.float32(QUANT_RANGE), eps)
    scale_arr = scale.reshape(1).astype(jnp.float32)

    # ---- Phase 1: tiled fake-quant + add ----
    out2d = pl.pallas_call(
        _fq_add_kernel,
        out_shape=jax.ShapeDtypeStruct((rows_padded, cols), orig_dtype),
        grid_spec=pltpu.PrefetchScalarGridSpec(
            num_scalar_prefetch=1,
            grid=(n_tiles,),
            in_specs=[
                pl.BlockSpec((block_rows, cols), lambda i, scale_ref: (i, 0)),
                pl.BlockSpec((block_rows, cols), lambda i, scale_ref: (i, 0)),
            ],
            out_specs=pl.BlockSpec((block_rows, cols), lambda i, scale_ref: (i, 0)),
        ),
        compiler_params=pltpu.CompilerParams(
            dimension_semantics=("parallel",),   # v7x: shard tiles across both TCs
            vmem_limit_bytes=VMEM_LIMIT_BYTES,
        ),
    )(scale_arr, res2d, sc2d)

    out = out2d.reshape(-1)
    if pad:
        out = out[:total]
    return out.reshape(orig_shape)


# ---------------------------------------------------------------------------
# Plain-JAX reference (mirrors the PyTorch forward exactly).
# ---------------------------------------------------------------------------
def _quant_add_reference(res, shortcut):
    min_val = jnp.minimum(jnp.min(res), jnp.min(shortcut))
    max_val = jnp.maximum(jnp.max(res), jnp.max(shortcut))
    float_range = jnp.maximum(jnp.abs(min_val), jnp.abs(max_val))
    scale = jnp.maximum(float_range / jnp.float32(QUANT_RANGE),
                        jnp.float32(jnp.finfo(jnp.float32).eps))

    def fq(x):
        y = x / scale
        r = jnp.sign(y) * jnp.floor(jnp.abs(y) + 0.5)   # Round.forward
        return jnp.clip(r, QUANT_MIN, QUANT_MAX) * scale

    return fq(res) + fq(shortcut)


# TODO(synk): stateful observer buffer updates (momentum moving-average / num_flag
# persistence), the ptq HistogramObserver percentile path and the STE backward are
# module state / training machinery with no Pallas forward equivalent; this kernel
# implements the functional first-call training forward.

if __name__ == "__main__":
    key = jax.random.PRNGKey(0)
    k1, k2 = jax.random.split(key)
    # Small NCHW shapes consistent with a residual add in a conv net.
    res = jax.random.normal(k1, (2, 4, 16, 16), dtype=jnp.float32) * 3.0
    shortcut = jax.random.normal(k2, (2, 4, 16, 16), dtype=jnp.float32) * 2.0

    out = quant_add(res, shortcut)
    out = jax.block_until_ready(out)

    ref = _quant_add_reference(res, shortcut)
    assert out.shape == res.shape and out.dtype == res.dtype
    assert jnp.allclose(out, ref, atol=1e-6, rtol=1e-6), "mismatch vs reference"

    print("KERNEL_OK")
</pallas_src>

<mosaic_0001>
module attributes {stable_mosaic.version = 11 : i64} {
  func.func @_absmax_kernel(%arg0: i32, %arg1: memref<2x1024xf32, #tpu.memory_space<vmem>>, %arg2: memref<2x1024xf32, #tpu.memory_space<vmem>>, %arg3: memref<1x1xf32, #tpu.memory_space<smem>>) attributes {dimension_semantics = [#tpu.dimension_semantics<arbitrary>], iteration_bounds = array<i64: 1>, scalar_prefetch = 0 : i64, scratch_operands = 0 : i64, tpu.core_type = #tpu.core_type<tc>, window_params = [{transform_indices = @transform_0, window_bounds = array<i64: 2, 1024>}, {transform_indices = @transform_1, window_bounds = array<i64: 2, 1024>}, {transform_indices = @transform_2, window_bounds = array<i64: 1, 1>}]} {
    %c0 = arith.constant 0 : index
    %c0_0 = arith.constant 0 : index
    %0 = vector.load %arg1[%c0, %c0_0] : memref<2x1024xf32, #tpu.memory_space<vmem>>, vector<2x1024xf32>
    %c0_1 = arith.constant 0 : index
    %c0_2 = arith.constant 0 : index
    %1 = vector.load %arg2[%c0_1, %c0_2] : memref<2x1024xf32, #tpu.memory_space<vmem>>, vector<2x1024xf32>
    %2 = math.absf %0 : vector<2x1024xf32>
    %3 = vector.shape_cast %2 : vector<2x1024xf32> to vector<1x2x1024xf32>
    %cst = arith.constant dense<0xFF800000> : vector<1xf32>
    %4 = vector.multi_reduction <maximumf>, %3, %cst [1, 2] : vector<1x2x1024xf32> to vector<1xf32>
    %5 = vector.shape_cast %4 : vector<1xf32> to vector<1x1x1xf32>
    %6 = vector.extract %5[0, 0, 0] : f32 from vector<1x1x1xf32>
    %7 = math.absf %1 : vector<2x1024xf32>
    %8 = vector.shape_cast %7 : vector<2x1024xf32> to vector<1x2x1024xf32>
    %cst_3 = arith.constant dense<0xFF800000> : vector<1xf32>
    %9 = vector.multi_reduction <maximumf>, %8, %cst_3 [1, 2] : vector<1x2x1024xf32> to vector<1xf32>
    %10 = vector.shape_cast %9 : vector<1xf32> to vector<1x1x1xf32>
    %11 = vector.extract %10[0, 0, 0] : f32 from vector<1x1x1xf32>
    %12 = arith.maximumf %6, %11 : f32
    %c0_i32 = arith.constant 0 : i32
    %13 = arith.cmpi eq, %arg0, %c0_i32 : i32
    %14 = arith.extui %13 : i1 to i32
    %c0_i32_4 = arith.constant 0 : i32
    %15 = arith.cmpi ne, %14, %c0_i32_4 : i32
    scf.if %15 {
      %c0_7 = arith.constant 0 : index
      %c0_8 = arith.constant 0 : index
      %19 = memref.load %arg3[%c0_7, %c0_8] : memref<1x1xf32, #tpu.memory_space<smem>>
      memref.store %12, %arg3[%c0_7, %c0_8] : memref<1x1xf32, #tpu.memory_space<smem>>
    } else {
    }
    %c0_i32_5 = arith.constant 0 : i32
    %16 = arith.cmpi sgt, %arg0, %c0_i32_5 : i32
    %17 = arith.extui %16 : i1 to i32
    %c0_i32_6 = arith.constant 0 : i32
    %18 = arith.cmpi ne, %17, %c0_i32_6 : i32
    scf.if %18 {
      %c0_7 = arith.constant 0 : index
      %c0_8 = arith.constant 0 : index
      %19 = memref.load %arg3[%c0_7, %c0_8] : memref<1x1xf32, #tpu.memory_space<smem>>
      %20 = arith.maximumf %19, %12 : f32
      %c0_9 = arith.constant 0 : index
      %c0_10 = arith.constant 0 : index
      %21 = memref.load %arg3[%c0_9, %c0_10] : memref<1x1xf32, #tpu.memory_space<smem>>
      memref.store %20, %arg3[%c0_9, %c0_10] : memref<1x1xf32, #tpu.memory_space<smem>>
    } else {
    }
    return
  }
  func.func @transform_0(%arg0: i32) -> (i32, i32) {
    %c0_i32 = arith.constant 0 : i32
    %c0_i32_0 = arith.constant 0 : i32
    return %arg0, %c0_i32 : i32, i32
  }
  func.func @transform_1(%arg0: i32) -> (i32, i32) {
    %c0_i32 = arith.constant 0 : i32
    %c0_i32_0 = arith.constant 0 : i32
    return %arg0, %c0_i32 : i32, i32
  }
  func.func @transform_2(%arg0: i32) -> (i32, i32) {
    %c0_i32 = arith.constant 0 : i32
    %c0_i32_0 = arith.constant 0 : i32
    %c0_i32_1 = arith.constant 0 : i32
    return %c0_i32, %c0_i32_0 : i32, i32
  }
}

</mosaic_0001>

<bundles_post_ra>
// kernel: tpu_custom_call.1
= control target key start
LH: loop header
LB: loop body
LE: loop exit
PB: predicated region body
PF: predicated region fallthrough
CT: control target
= control target key end

     0   :  { %7 = vsyncpa [#allocation3], 0  ;;  %s317_s0 = inlined_call_operand.hbm [shape: f32[2,1024], index: 0, kind: input, shape index: {}]   ;;  %s318_s1 = inlined_call_operand.hbm [shape: f32[2,1024], index: 1, kind: input, shape index: {}]   ;;  %s319_s2 = inlined_call_operand.hbm [shape: f32[1,1], index: 2, kind: output, shape index: {}]  }
   0x1   :  { %8 = vsyncpa [#allocation6], 0 }
   0x2   :  { %9 = vsyncpa [#allocation4], 0  ;;  %s273_s9 = smov [#allocation2]   ;;  %s274_s11 = smov [#allocation5]  }
   0x3   :  { %s16_s10 = sshll.u32 %s273_s9, 4  ;;  %s26_s12 = sshll.u32 %s274_s11, 4  ;;  %s17_s10 = int_to_ptr.vmem [resolvable:$true] %s16_s10  ;;  %s27_s12 = int_to_ptr.vmem [resolvable:$true] %s26_s12 }
   0x4   :  { %s227_s13 = scalar_lea.vmem %s17_s10, 256  ;;  %p232_p1 = scmp.lt.s32.totalorder %s17_s10, %s17_s10 }
   0x5   :  { %p228_p0 = scmp.ne.s32.totalorder %s17_s10, %s227_s13  ;;  %p233_p2 = scmp.lt.s32.totalorder %s227_s13, %s227_s13 }
   0x7   :  { %p234_p3 = por %p233_p2, %p232_p1 }
   0x9   :  { %p235_p4 = pnand %p234_p3, %p228_p0 }
   0xb   :  { %238 = shalt.err (!%p235_p4)
}
   0xc   :  { %19 = dma.hbm_to_vmem [thread:$0]  %s317_s0, 256, %s17_s10, [#allocation3]  }
   0xd   :  { %s247_s16 = scalar_lea.vmem %s27_s12, 256  ;;  %p252_p6 = scmp.lt.s32.totalorder %s27_s12, %s27_s12 }
   0xe   :  { %p248_p5 = scmp.ne.s32.totalorder %s27_s12, %s247_s16  ;;  %p253_p7 = scmp.lt.s32.totalorder %s247_s16, %s247_s16 }
  0x10   :  { %p254_p8 = por %p253_p7, %p252_p6 }
  0x12   :  { %p255_p9 = pnand %p254_p8, %p248_p5 }
  0x14   :  { %258 = shalt.err (!%p255_p9)
}
  0x15   :  { %29 = dma.hbm_to_vmem [thread:$0]  %s318_s1, 256, %s27_s12, [#allocation6]  }
  0x16   :  { %267 = dma.done.wait [#allocation3], 256  }
  0x17   :  { %268 = vsyncadd [#allocation3], 4294967040 }
  0x18   :  { %269 = dma.done.wait [#allocation6], 256  }
  0x19   :  { %270 = vsyncadd [#allocation6], 4294967040  ;;  %v48_v0 = vlaneseq  ;;  %v275_v1 = vmov 1983009808   ;;  %v36_v6 = vld [vmem:[#allocation2] sm:$0xff]  ;;  %v37_v7 = vld [vmem:[#allocation2 + $0x8] sm:$0xff] }
  0x1a   :  { %v46_v2 = vunpack.c.l.s4 %v275_v1  ;;  %v38_v8 = vld [vmem:[#allocation5] sm:$0xff]  ;;  %v40_v9 = vand.u32 2147483647, %v36_v6  ;;  %v41_v10 = vand.u32 2147483647, %v37_v7  ;;  %v39_v11 = vld [vmem:[#allocation5 + $0x8] sm:$0xff] }
  0x1b   :  { %v49_v3 = vshrl.u32 %v48_v0, 7  ;;  %vm86_vm0 = vcmask 1041408   ;;  %v111_v12 = vand.u32 2147483647, %v38_v8  ;;  %v112_v13 = vand.u32 2147483647, %v39_v11 }
  0x1c   :  { %v47_v4 = vunpack.c.0.s8 %v46_v2  ;;  %v44_v14 = vcombine.high %v40_v9, %v40_v9  ;;  %v61_v16 = vcombine.high %v41_v10, %v41_v10  ;;  %s276_s20 = smov [#allocation7]  }
  0x1d   :  { %v115_v18 = vcombine.high %v111_v12, %v111_v12  ;;  %v132_v20 = vcombine.high %v112_v13, %v112_v13 }
  0x1e   :  { %v50_v5 = vsub.s32 %v47_v4, %v49_v3 }
  0x20   :  { %v51_v15 = vrot.slane %v40_v9, %v50_v5  ;;  %v68_v17 = vrot.slane %v41_v10, %v50_v5  ;;  %v122_v19 = vrot.slane %v111_v12, %v50_v5  ;;  %v139_v21 = vrot.slane %v112_v13, %v50_v5 }
  0x21   :  { %v58_v22 = vrot.slane %v44_v14, %v50_v5  ;;  %v75_v24 = vrot.slane %v61_v16, %v50_v5  ;;  %v129_v28 = vrot.slane %v115_v18, %v50_v5  ;;  %v146_v43 = vrot.slane %v132_v20, %v50_v5 }
  0x22   :  { %v59_v23 = vcombine.high %v51_v15, %v51_v15  ;;  %v76_v25 = vcombine.high %v68_v17, %v68_v17  ;;  %v87_v26 = vsel %vm86_vm0, %v51_v15, -inf  ;;  %v91_v27 = vsel %vm86_vm0, %v68_v17, -inf }
  0x23   :  { %v130_v29 = vcombine.high %v122_v19, %v122_v19  ;;  %v60_v30 = vcombine.high %v58_v22, %v58_v22  ;;  %v77_v31 = vcombine.high %v75_v24, %v75_v24  ;;  %v89_v33 = vsel %vm86_vm0, %v58_v22, -inf }
  0x24   :  { %v88_v32 = vsel %vm86_vm0, %v59_v23, -inf  ;;  %v92_v34 = vmax.f32 %v87_v26, %v91_v27  ;;  %v93_v35 = vsel %vm86_vm0, %v76_v25, -inf  ;;  %v95_v36 = vsel %vm86_vm0, %v75_v24, -inf }
  0x25   :  { %v131_v37 = vcombine.high %v129_v28, %v129_v28  ;;  %v90_v38 = vsel %vm86_vm0, %v60_v30, -inf  ;;  %v94_v39 = vmax.f32 %v88_v32, %v93_v35  ;;  %v96_v40 = vmax.f32 %v89_v33, %v95_v36 }
  0x26   :  { %v97_v41 = vsel %vm86_vm0, %v77_v31, -inf  ;;  %v147_v44 = vcombine.high %v139_v21, %v139_v21  ;;  %v157_v45 = vsel %vm86_vm0, %v122_v19, -inf  ;;  %v158_v47 = vsel %vm86_vm0, %v130_v29, -inf }
  0x27   :  { %v98_v42 = vmax.f32 %v90_v38, %v97_v41  ;;  %v99_v46 = vmax.f32 %v92_v34, %v94_v39  ;;  %v159_v48 = vsel %vm86_vm0, %v129_v28, -inf  ;;  %v160_v49 = vsel %vm86_vm0, %v131_v37, -inf }
  0x28   :  { %v148_v51 = vcombine.high %v146_v43, %v146_v43  ;;  %v161_v52 = vsel %vm86_vm0, %v139_v21, -inf  ;;  %v163_v53 = vsel %vm86_vm0, %v147_v44, -inf  ;;  %v165_v56 = vsel %vm86_vm0, %v146_v43, -inf }
  0x29   :  { %v100_v50 = vmax.f32 %v96_v40, %v98_v42  ;;  %v162_v54 = vmax.f32 %v157_v45, %v161_v52  ;;  %v164_v55 = vmax.f32 %v158_v47, %v163_v53  ;;  %v166_v58 = vmax.f32 %v159_v48, %v165_v56 }
  0x2a   :  { %v167_v59 = vsel %vm86_vm0, %v148_v51, -inf }
  0x2b   :  { %v101_v57 = vmax.f32 %v99_v46, %v100_v50  ;;  %v168_v60 = vmax.f32 %v160_v49, %v167_v59  ;;  %v169_v61 = vmax.f32 %v162_v54, %v164_v55 }
  0x2d   :  { %102 = vmax.xlane.f32.xlu0 %v101_v57  ;;  %v170_v62 = vmax.f32 %v166_v58, %v168_v60 }
  0x2f   :  { %v171_v63 = vmax.f32 %v169_v61, %v170_v62 }
  0x31   :  { %172 = vmax.xlane.f32.xlu0 %v171_v63 }
  0xb6   :  { %v103_v0 = vpop.xlane.xlu0 %102 }
  0xb7   :  { %v104_v1 = vrot.slane %v103_v0, 4 }
  0xb9   :  { %v105_v2 = vmax.f32 %v103_v0, %v104_v1 }
  0xba   :  { %v173_v4 = vpop.xlane.xlu0 %172 }
  0xbb   :  { %v106_v3 = vrot.slane %v105_v2, 2  ;;  %v174_v5 = vrot.slane %v173_v4, 4 }
  0xbd   :  { %v107_v6 = vmax.f32 %v105_v2, %v106_v3  ;;  %v175_v7 = vmax.f32 %v173_v4, %v174_v5 }
  0xbf   :  { %v108_v8 = vrot.slane %v107_v6, 1  ;;  %v176_v9 = vrot.slane %v175_v7, 2 }
  0xc1   :  { %v109_v10 = vmax.f32 %v107_v6, %v108_v8  ;;  %v177_v11 = vmax.f32 %v175_v7, %v176_v9 }
  0xc3   :  { %211 = vpush %v109_v10  ;;  %v178_v12 = vrot.slane %v177_v11, 1 }
  0xc5   :  { %v179_v13 = vmax.f32 %v177_v11, %v178_v12 }
  0xc7   :  { %213 = vpush %v179_v13 }
  0xf4   :  { %s212_s0 = spop %211 }
  0xf8   :  { %s214_s1 = spop %213 }
  0xf9   :  { %s181_s19 = smax.f32 %s214_s1, %s212_s0 }
  0xfa   :  { %187 = sst [smem:[#allocation7]] %s181_s19 }
  0xfb   :  { %203 = dma.smem_to_hbm %s276_s20, 16, %s319_s2, [#allocation4]  }
  0xfc   :  { %271 = dma.done.wait [#allocation4], 16  }
  0xfd   :  { %272 = vsyncadd [#allocation4], 4294967280 }
  0xfe   :  { %207 = sfence }
  0xff   :  { %208 = vsyncpa [#allocation3], 1 }
 0x100   :  { %209 = vsyncpa [#allocation6], 1 }
 0x101   :  { %210 = vsyncpa [#allocation4], 1 }

</bundles_post_ra>
